<compile_context>
chip_gen: v6e
topology: v6e:2x2x1
jax: 0.10.0
libtpu: 0.0.40
codegen_flags: <defaults>
</compile_context>

<pallas_src>
import functools
import numpy as np
import jax
import jax.numpy as jnp
from jax.experimental import pallas as pl
from jax.experimental.pallas import tpu as pltpu


def _round_up(x, m):
    return ((x + m - 1) // m) * m


def _cdiv(a, b):
    return -(-a // b)


# ---------------------------------------------------------------------------
# Pallas kernel: one batch tile through both MLP branches (fused layer 1,
# single lane-dense output store)
# ---------------------------------------------------------------------------
def decoder_kernel(x_ref, w1_ref, b1_ref, w2_ref, b2_ref, out_ref, *, hp):
    x = x_ref[...]                                                # (TB, F) f32

    # fused layer 1: one matmul covers both branches (width 2*Hp)
    h = jnp.tanh(
        jnp.dot(x, w1_ref[...], preferred_element_type=jnp.float32)
        + b1_ref[...])                                            # (TB, 2*Hp)
    hn = h[:, :hp]            # lane-aligned static slices (Hp % 128 == 0)
    hi = h[:, hp:]

    # layer 2 per branch; w2 is stacked as (2, Hp, Op)
    yn = jnp.dot(hn, w2_ref[0], preferred_element_type=jnp.float32)  # (TB, Op)
    yi = jnp.dot(hi, w2_ref[1], preferred_element_type=jnp.float32)  # (TB, Op)

    # single lane-dense (TB, 2*Op) store, Op a multiple of 128
    out_ref[...] = (jnp.concatenate([yn, yi], axis=-1)
                    + b2_ref[...]).astype(out_ref.dtype)


# ---------------------------------------------------------------------------
# Wrapper
# ---------------------------------------------------------------------------
def decoder_forward(data, packed, *, flag, channels, tb_max=1024):
    """data: (B, in_features) float32. packed: output of pack_params()."""
    B, F = data.shape
    Hp, Op, O = packed['Hp'], packed['Op'], packed['O']

    # --- batch tiling: 8-row alignment, big tiles, no dead remainder tile ---
    Bp8 = _round_up(B, 8)
    n_steps = max(1, _cdiv(Bp8, tb_max))
    if n_steps == 1 and Bp8 >= 256:
        n_steps = 2                    # give v7x's second TensorCore work
    TB = _round_up(_cdiv(Bp8, n_steps), 8)
    Bp = TB * n_steps                  # pads at most 8*(n_steps) rows total

    x = data if data.dtype == jnp.float32 else data.astype(jnp.float32)
    if Bp != B:
        x = jnp.pad(x, ((0, Bp - B), (0, 0)))

    kernel = functools.partial(decoder_kernel, hp=Hp)

    out = pl.pallas_call(
        kernel,
        out_shape=jax.ShapeDtypeStruct((Bp, 2 * Op), jnp.float32),
        grid=(n_steps,),
        in_specs=[
            pl.BlockSpec((TB, F), lambda i: (i, 0)),
            # resident (constant-index) parameter slabs
            pl.BlockSpec(packed['w1'].shape, lambda i: (0, 0)),
            pl.BlockSpec(packed['b1'].shape, lambda i: (0, 0)),
            pl.BlockSpec(packed['w2'].shape, lambda i: (0, 0, 0)),
            pl.BlockSpec(packed['b2'].shape, lambda i: (0, 0)),
        ],
        out_specs=pl.BlockSpec((TB, 2 * Op), lambda i: (i, 0)),
        compiler_params=pltpu.CompilerParams(
            dimension_semantics=("parallel",)),
    )(x, packed['w1'], packed['b1'], packed['w2'], packed['b2'])

    noise = out[:B, :O]
    info = out[:B, Op:Op + O]
    if flag:
        noise = noise.reshape(B, channels, -1)
        info = info.reshape(B, channels, -1)
    return noise, info


# ---------------------------------------------------------------------------
# One-time parameter packing (all layout work hoisted out of the forward):
#   * transpose PyTorch (out, in) weights to (in, out)
#   * pad hidden width to Hp = round_up(H, 128) and output width to
#     Op = round_up(O, 128) with zeros (keeps slices / stores lane-aligned,
#     padded columns contribute exactly zero)
#   * concatenate both branches' layer-1 params, stack layer-2 weights,
#     concatenate layer-2 biases -> 4 arrays total at the kernel boundary
# ---------------------------------------------------------------------------
def pack_params(raw):
    H, F = raw['n_w1'].shape            # layer-1 weight is (H, F)
    O = raw['n_w2'].shape[0]            # layer-2 weight is (O, H)
    Hp = _round_up(H, 128)
    Op = _round_up(O, 128)

    def pad_w1(w):                      # (H, F) -> (F, Hp)
        wt = jnp.transpose(w).astype(jnp.float32)
        return jnp.pad(wt, ((0, 0), (0, Hp - H)))

    def pad_b1(b):                      # (H,) -> (Hp,)
        return jnp.pad(b.astype(jnp.float32), (0, Hp - H))

    def pad_w2(w):                      # (O, H) -> (Hp, Op)
        wt = jnp.transpose(w).astype(jnp.float32)
        return jnp.pad(wt, ((0, Hp - H), (0, Op - O)))

    def pad_b2(b):                      # (O,) -> (Op,)
        return jnp.pad(b.astype(jnp.float32), (0, Op - O))

    w1 = jnp.concatenate([pad_w1(raw['n_w1']), pad_w1(raw['i_w1'])], axis=1)
    b1 = jnp.concatenate([pad_b1(raw['n_b1']), pad_b1(raw['i_b1'])])[None, :]
    w2 = jnp.stack([pad_w2(raw['n_w2']), pad_w2(raw['i_w2'])], axis=0)
    b2 = jnp.concatenate([pad_b2(raw['n_b2']), pad_b2(raw['i_b2'])])[None, :]
    return dict(w1=w1, b1=b1, w2=w2, b2=b2, H=H, Hp=Hp, O=O, Op=Op)


# ---------------------------------------------------------------------------
# Deterministic parameter init (nn.Linear-style, PyTorch (out, in) layout)
# ---------------------------------------------------------------------------
def init_params(key, in_features, hidden, out_features, flag, channels):
    if flag:
        h_dim = hidden * channels
        o_dim = out_features * channels
    else:
        h_dim = hidden
        o_dim = out_features
    ks = iter(jax.random.split(key, 8))

    def linear(fan_in, fan_out):
        bound = 1.0 / np.sqrt(fan_in)
        w = jax.random.uniform(next(ks), (fan_out, fan_in), jnp.float32,
                               -bound, bound)
        b = jax.random.uniform(next(ks), (fan_out,), jnp.float32,
                               -bound, bound)
        return w, b

    i_w1, i_b1 = linear(in_features, h_dim)
    i_w2, i_b2 = linear(h_dim, o_dim)
    n_w1, n_b1 = linear(in_features, h_dim)
    n_w2, n_b2 = linear(h_dim, o_dim)
    return dict(i_w1=i_w1, i_b1=i_b1, i_w2=i_w2, i_b2=i_b2,
                n_w1=n_w1, n_b1=n_b1, n_w2=n_w2, n_b2=n_b2)


# ---------------------------------------------------------------------------
# Pure-JAX reference (same semantics as the PyTorch forward)
# ---------------------------------------------------------------------------
def decoder_reference(data, raw, *, flag, channels):
    def mlp(x, w1, b1, w2, b2):
        h = jnp.tanh(x @ w1.T + b1)
        return h @ w2.T + b2

    noise = mlp(data, raw['n_w1'], raw['n_b1'], raw['n_w2'], raw['n_b2'])
    info = mlp(data, raw['i_w1'], raw['i_b1'], raw['i_w2'], raw['i_b2'])
    if flag:
        noise = noise.reshape(data.shape[0], channels, -1)
        info = info.reshape(data.shape[0], channels, -1)
    return noise, info


if __name__ == "__main__":
    key = jax.random.PRNGKey(0)

    # ---- config 1: flag=True (channelized decoder), lane-dense dims -------
    B, IN_F, HID, OUT_F, CH = 4, 16, 2, 2, 64     # hidden*ch = 128, out*ch = 128
    k1, k2, k3, k4 = jax.random.split(key, 4)

    data = jax.random.normal(k1, (B, IN_F), jnp.float32)
    raw = init_params(k2, IN_F, HID, OUT_F, flag=True, channels=CH)
    packed = pack_params(raw)

    noise, info = decoder_forward(data, packed, flag=True, channels=CH)
    noise = jax.block_until_ready(noise)
    info = jax.block_until_ready(info)

    noise_ref, info_ref = decoder_reference(data, raw, flag=True, channels=CH)
    assert noise.shape == (B, CH, OUT_F) and info.shape == (B, CH, OUT_F)
    np.testing.assert_allclose(np.asarray(noise), np.asarray(noise_ref),
                               rtol=1e-4, atol=1e-4)
    np.testing.assert_allclose(np.asarray(info), np.asarray(info_ref),
                               rtol=1e-4, atol=1e-4)

    # ---- config 2: flag=False (plain decoder), odd batch & non-128 output -
    B2, IN2, HID2, OUT2 = 5, 16, 32, 48
    data2 = jax.random.normal(k3, (B2, IN2), jnp.float32)
    raw2 = init_params(k4, IN2, HID2, OUT2, flag=False, channels=CH)
    packed2 = pack_params(raw2)

    noise2, info2 = decoder_forward(data2, packed2, flag=False, channels=CH)
    noise2 = jax.block_until_ready(noise2)
    info2 = jax.block_until_ready(info2)

    noise2_ref, info2_ref = decoder_reference(data2, raw2, flag=False,
                                              channels=CH)
    assert noise2.shape == (B2, OUT2) and info2.shape == (B2, OUT2)
    np.testing.assert_allclose(np.asarray(noise2), np.asarray(noise2_ref),
                               rtol=1e-4, atol=1e-4)
    np.testing.assert_allclose(np.asarray(info2), np.asarray(info2_ref),
                               rtol=1e-4, atol=1e-4)

    print("KERNEL_OK")
</pallas_src>

<mosaic_0001>
module attributes {stable_mosaic.version = 11 : i64} {
  func.func @decoder_kernel(%arg0: i32, %arg1: memref<8x16xf32, #tpu.memory_space<vmem>>, %arg2: memref<16x256xf32, #tpu.memory_space<vmem>>, %arg3: memref<1x256xf32, #tpu.memory_space<vmem>>, %arg4: memref<2x128x128xf32, #tpu.memory_space<vmem>>, %arg5: memref<1x256xf32, #tpu.memory_space<vmem>>, %arg6: memref<8x256xf32, #tpu.memory_space<vmem>>) attributes {dimension_semantics = [#tpu.dimension_semantics<parallel>], iteration_bounds = array<i64: 1>, scalar_prefetch = 0 : i64, scratch_operands = 0 : i64, tpu.core_type = #tpu.core_type<tc>, window_params = [{transform_indices = @transform_0, window_bounds = array<i64: 8, 16>}, {pipeline_mode = #tpu.pipeline_mode<synchronous>, transform_indices = @transform_1, window_bounds = array<i64: 16, 256>}, {pipeline_mode = #tpu.pipeline_mode<synchronous>, transform_indices = @transform_2, window_bounds = array<i64: 1, 256>}, {pipeline_mode = #tpu.pipeline_mode<synchronous>, transform_indices = @transform_3, window_bounds = array<i64: 2, 128, 128>}, {pipeline_mode = #tpu.pipeline_mode<synchronous>, transform_indices = @transform_4, window_bounds = array<i64: 1, 256>}, {transform_indices = @transform_5, window_bounds = array<i64: 8, 256>}]} {
    %c0 = arith.constant 0 : index
    %c0_0 = arith.constant 0 : index
    %0 = vector.load %arg1[%c0, %c0_0] : memref<8x16xf32, #tpu.memory_space<vmem>>, vector<8x16xf32>
    %c0_1 = arith.constant 0 : index
    %c0_2 = arith.constant 0 : index
    %1 = vector.load %arg2[%c0_1, %c0_2] : memref<16x256xf32, #tpu.memory_space<vmem>>, vector<16x256xf32>
    %cst = arith.constant dense<0.000000e+00> : vector<8x256xf32>
    %2 = tpu.matmul %0, %1, %cst {dimension_numbers = #tpu.dot_dimension_numbers<[1], [0], [0], [1], [0, 0, 1, 1], [], []>} : vector<8x16xf32>, vector<16x256xf32>, vector<8x256xf32> -> vector<8x256xf32>
    %c0_3 = arith.constant 0 : index
    %c0_4 = arith.constant 0 : index
    %3 = vector.load %arg3[%c0_3, %c0_4] : memref<1x256xf32, #tpu.memory_space<vmem>>, vector<1x256xf32>
    %4 = vector.broadcast %3 : vector<1x256xf32> to vector<8x256xf32>
    %5 = arith.addf %2, %4 : vector<8x256xf32>
    %6 = math.tanh %5 : vector<8x256xf32>
    %7 = vector.extract_strided_slice %6 {offsets = [0, 0], sizes = [8, 128], strides = [1, 1]} : vector<8x256xf32> to vector<8x128xf32>
    %8 = vector.extract_strided_slice %6 {offsets = [0, 128], sizes = [8, 128], strides = [1, 1]} : vector<8x256xf32> to vector<8x128xf32>
    %c0_5 = arith.constant 0 : index
    %c0_6 = arith.constant 0 : index
    %c0_7 = arith.constant 0 : index
    %9 = vector.load %arg4[%c0_5, %c0_6, %c0_7] : memref<2x128x128xf32, #tpu.memory_space<vmem>>, vector<1x128x128xf32>
    %10 = vector.shape_cast %9 : vector<1x128x128xf32> to vector<128x128xf32>
    %cst_8 = arith.constant dense<0.000000e+00> : vector<8x128xf32>
    %11 = tpu.matmul %7, %10, %cst_8 {dimension_numbers = #tpu.dot_dimension_numbers<[1], [0], [0], [1], [0, 0, 1, 1], [], []>} : vector<8x128xf32>, vector<128x128xf32>, vector<8x128xf32> -> vector<8x128xf32>
    %c1 = arith.constant 1 : index
    %c0_9 = arith.constant 0 : index
    %c0_10 = arith.constant 0 : index
    %12 = vector.load %arg4[%c1, %c0_9, %c0_10] : memref<2x128x128xf32, #tpu.memory_space<vmem>>, vector<1x128x128xf32>
    %13 = vector.shape_cast %12 : vector<1x128x128xf32> to vector<128x128xf32>
    %cst_11 = arith.constant dense<0.000000e+00> : vector<8x128xf32>
    %14 = tpu.matmul %8, %13, %cst_11 {dimension_numbers = #tpu.dot_dimension_numbers<[1], [0], [0], [1], [0, 0, 1, 1], [], []>} : vector<8x128xf32>, vector<128x128xf32>, vector<8x128xf32> -> vector<8x128xf32>
    %15 = tpu.concatenate %11, %14 in 1 : vector<8x128xf32>, vector<8x128xf32> -> vector<8x256xf32>
    %c0_12 = arith.constant 0 : index
    %c0_13 = arith.constant 0 : index
    %16 = vector.load %arg5[%c0_12, %c0_13] : memref<1x256xf32, #tpu.memory_space<vmem>>, vector<1x256xf32>
    %17 = vector.broadcast %16 : vector<1x256xf32> to vector<8x256xf32>
    %18 = arith.addf %15, %17 : vector<8x256xf32>
    %c0_14 = arith.constant 0 : index
    %c0_15 = arith.constant 0 : index
    %19 = vector.load %arg6[%c0_14, %c0_15] : memref<8x256xf32, #tpu.memory_space<vmem>>, vector<8x256xf32>
    tpu.vector_store %arg6[%c0_14, %c0_15], %18 {strides = array<i32>} : memref<8x256xf32, #tpu.memory_space<vmem>>, vector<8x256xf32>,
    return
  }
  func.func @transform_0(%arg0: i32) -> (i32, i32) {
    %c0_i32 = arith.constant 0 : i32
    %c0_i32_0 = arith.constant 0 : i32
    return %arg0, %c0_i32 : i32, i32
  }
  func.func @transform_1(%arg0: i32) -> (i32, i32) {
    %c0_i32 = arith.constant 0 : i32
    %c0_i32_0 = arith.constant 0 : i32
    %c0_i32_1 = arith.constant 0 : i32
    return %c0_i32, %c0_i32_0 : i32, i32
  }
  func.func @transform_2(%arg0: i32) -> (i32, i32) {
    %c0_i32 = arith.constant 0 : i32
    %c0_i32_0 = arith.constant 0 : i32
    %c0_i32_1 = arith.constant 0 : i32
    return %c0_i32, %c0_i32_0 : i32, i32
  }
  func.func @transform_3(%arg0: i32) -> (i32, i32, i32) {
    %c0_i32 = arith.constant 0 : i32
    %c0_i32_0 = arith.constant 0 : i32
    %c0_i32_1 = arith.constant 0 : i32
    %c0_i32_2 = arith.constant 0 : i32
    return %c0_i32, %c0_i32_0, %c0_i32_1 : i32, i32, i32
  }
  func.func @transform_4(%arg0: i32) -> (i32, i32) {
    %c0_i32 = arith.constant 0 : i32
    %c0_i32_0 = arith.constant 0 : i32
    %c0_i32_1 = arith.constant 0 : i32
    return %c0_i32, %c0_i32_0 : i32, i32
  }
  func.func @transform_5(%arg0: i32) -> (i32, i32) {
    %c0_i32 = arith.constant 0 : i32
    %c0_i32_0 = arith.constant 0 : i32
    return %arg0, %c0_i32 : i32, i32
  }
}

</mosaic_0001>

<bundles_post_ra>
// kernel: tpu_custom_call.1
= control target key start
LH: loop header
LB: loop body
LE: loop exit
PB: predicated region body
PF: predicated region fallthrough
CT: control target
= control target key end

     0   :  { %10 = vsyncpa [#allocation3], 0  ;;  %s657_s0 = inlined_call_operand.hbm [shape: f32[8,16], index: 0, kind: input, shape index: {}]   ;;  %s658_s1 = inlined_call_operand.hbm [shape: f32[16,256], index: 1, kind: input, shape index: {}]   ;;  %s659_s2 = inlined_call_operand.vmem [shape: f32[1,256], index: 2, kind: input, shape index: {}]   ;;  %s660_s3 = inlined_call_operand.hbm [shape: f32[2,128,128], index: 3, kind: input, shape index: {}]   ;;  %s661_s4 = inlined_call_operand.vmem [shape: f32[1,256], index: 4, kind: input, shape index: {}]   ;;  %s662_s5 = inlined_call_operand.hbm [shape: f32[8,256], index: 5, kind: output, shape index: {}]  }
   0x1   :  { %11 = vsyncpa [#allocation6], 0 }
   0x2   :  { %12 = vsyncpa [#allocation4], 0  ;;  %s564_s18 = smov [#allocation5]  }
   0x3   :  { %s28_s19 = sshll.u32 %s564_s18, 4  ;;  %s29_s19 = int_to_ptr.vmem [resolvable:$true] %s28_s19 }
   0x4   :  { %s486_s20 = scalar_lea.vmem %s29_s19, 512  ;;  %p491_p1 = scmp.lt.s32.totalorder %s29_s19, %s29_s19 }
   0x5   :  { %p487_p0 = scmp.ne.s32.totalorder %s29_s19, %s486_s20  ;;  %p492_p2 = scmp.lt.s32.totalorder %s486_s20, %s486_s20 }
   0x7   :  { %p493_p3 = por %p492_p2, %p491_p1 }
   0x9   :  { %p494_p4 = pnand %p493_p3, %p487_p0 }
   0xb   :  { %497 = shalt.err (!%p494_p4)
}
   0xc   :  { %s565_s21 = smov 256   ;;  %s566_s22 = smov 16  }
   0xd   :  { %34 = dma.hbm_to_vmem [thread:$0]  %s658_s1, 512, %s29_s19, [#allocation6], %s565_s21, %s565_s21, %s566_s22  }
   0xe   :  { %s567_s25 = smov [#allocation2]   ;;  %s568_s27 = smov [#allocation7]  }
   0xf   :  { %s19_s26 = sshll.u32 %s567_s25, 4  ;;  %s42_s28 = sshll.u32 %s568_s27, 4  ;;  %s20_s26 = int_to_ptr.vmem [resolvable:$true] %s19_s26  ;;  %s43_s28 = int_to_ptr.vmem [resolvable:$true] %s42_s28 }
  0x10   :  { %s506_s29 = scalar_lea.vmem %s20_s26, 128  ;;  %p511_p6 = scmp.lt.s32.totalorder %s20_s26, %s20_s26 }
  0x11   :  { %p507_p5 = scmp.ne.s32.totalorder %s20_s26, %s506_s29  ;;  %p512_p7 = scmp.lt.s32.totalorder %s506_s29, %s506_s29 }
  0x13   :  { %p513_p8 = por %p512_p7, %p511_p6 }
  0x15   :  { %p514_p9 = pnand %p513_p8, %p507_p5 }
  0x17   :  { %517 = shalt.err (!%p514_p9)
}
  0x18   :  { %22 = dma.hbm_to_vmem [thread:$0]  %s657_s0, 128, %s20_s26, [#allocation3]  }
  0x19   :  { %s526_s7 = scalar_lea.vmem %s43_s28, 4096  ;;  %p531_p11 = scmp.lt.s32.totalorder %s43_s28, %s43_s28 }
  0x1a   :  { %p527_p10 = scmp.ne.s32.totalorder %s43_s28, %s526_s7  ;;  %p532_p12 = scmp.lt.s32.totalorder %s526_s7, %s526_s7 }
  0x1c   :  { %p533_p13 = por %p532_p12, %p531_p11 }
  0x1e   :  { %p534_p0 = pnand %p533_p13, %p527_p10 }
  0x20   :  { %537 = shalt.err (!%p534_p0)
}
  0x21   :  { %s569_s1 = smov 128   ;;  %s570_s8 = smov 8  }
  0x22   :  { %48 = dma.hbm_to_vmem [thread:$0]  %s660_s3, 4096, %s43_s28, [#allocation6], %s569_s1, %s569_s1, %s570_s8  }
  0x23   :  { %558 = dma.done.wait [#allocation3], 128  }
  0x24   :  { %559 = vsyncadd [#allocation3], 4294967168 }
  0x25   :  { %560 = dma.done.wait [#allocation6], 4608  }
  0x26   :  { %561 = vsyncadd [#allocation6], 4294962688  ;;  %v571_v0 = vmov 0.0   ;;  %v64_v1 = vld [vmem:[#allocation5 + $0x18] sm:$0xff]  ;;  %v63_v2 = vld [vmem:[#allocation5 + $0x10] sm:$0xff]  ;;  %vm77_vm0 = vcmask 130048   ;;  %v67_v38 = vlaneseq }
  0x27   :  { %145 = vmatprep.mubr.f32.mxu0 %v571_v0  ;;  %394 = vmatprep.subr.mxu1 %v571_v0  ;;  %v62_v3 = vld [vmem:[#allocation5 + $0x8] sm:$0xff]  ;;  %v61_v4 = vld [vmem:[#allocation5] sm:$0xff]  ;;  %v169_v5 = vld [vmem:[#allocation7 + $0x78] sm:$0xff]  ;;  %vm572_vm1 = vmmov 0  }
  0x28   :  { %109 = vmatprep.subr.mxu0 %v64_v1  ;;  %v60_v6 = vld [vmem:[#allocation2] sm:$0xff]  ;;  %395 = vmatpush3.msra.mxu1 %v169_v5  ;;  %v168_v7 = vld [vmem:[#allocation7 + $0x70] sm:$0xff]  ;;  %v167_v9 = vld [vmem:[#allocation7 + $0x68] sm:$0xff]  ;;  %v68_v39 = vshrl.u32 %v67_v38, 7 }
  0x29   :  { %110 = vmatpush1.msra.mxu0 %v63_v2  ;;  %396 = vmatprep.subr.mxu1 %v571_v0  ;;  %v256_v8 = vld [vmem:[#allocation7 + $0xf8] sm:$0xff]  ;;  %v255_v10 = vld [vmem:[#allocation7 + $0xf0] sm:$0xff]  ;;  %v166_v11 = vld [vmem:[#allocation7 + $0x60] sm:$0xff] }
  0x2a   :  { %111 = vmatprep.subr.mxu0 %v62_v3  ;;  %397 = vmatpush3.msra.mxu1 %v168_v7  ;;  %v254_v12 = vld [vmem:[#allocation7 + $0xe8] sm:$0xff]  ;;  %v165_v13 = vld [vmem:[#allocation7 + $0x58] sm:$0xff]  ;;  %v253_v14 = vld [vmem:[#allocation7 + $0xe0] sm:$0xff]  ;;  %v69_v40 = vsub.s32 0, %v68_v39  ;;  %v73_v42 = vsub.s32 1, %v68_v39 }
  0x2b   :  { %112 = vmatpush1.msra.mxu0 %v61_v4  ;;  %398 = vmatprep.subr.mxu1 %v571_v0  ;;  %v164_v15 = vld [vmem:[#allocation7 + $0x50] sm:$0xff]  ;;  %v252_v16 = vld [vmem:[#allocation7 + $0xd8] sm:$0xff]  ;;  %v163_v17 = vld [vmem:[#allocation7 + $0x48] sm:$0xff] }
  0x2c   :  { %359 = vmatmul.mubr.msk.f32.vlgmr.msra.gmra.mxu0 %vm77_vm0, %v60_v6  ;;  %429 = vmatprep.subr.mxu0 %v571_v0  ;;  %v251_v18 = vld [vmem:[#allocation7 + $0xd0] sm:$0xff]  ;;  %v162_v19 = vld [vmem:[#allocation7 + $0x40] sm:$0xff]  ;;  %v250_v20 = vld [vmem:[#allocation7 + $0xc8] sm:$0xff] }
  0x2d   :  { %430 = vmatpush3.msra.mxu0 %v256_v8  ;;  %399 = vmatpush3.msra.mxu1 %v167_v9  ;;  %v161_v21 = vld [vmem:[#allocation7 + $0x38] sm:$0xff]  ;;  %v249_v22 = vld [vmem:[#allocation7 + $0xc0] sm:$0xff]  ;;  %v160_v23 = vld [vmem:[#allocation7 + $0x30] sm:$0xff] }
  0x2e   :  { %431 = vmatprep.subr.mxu0 %v571_v0  ;;  %400 = vmatprep.subr.mxu1 %v571_v0  ;;  %v248_v24 = vld [vmem:[#allocation7 + $0xb8] sm:$0xff]  ;;  %v159_v25 = vld [vmem:[#allocation7 + $0x28] sm:$0xff]  ;;  %v247_v26 = vld [vmem:[#allocation7 + $0xb0] sm:$0xff] }
  0x2f   :  { %432 = vmatpush3.msra.mxu0 %v255_v10  ;;  %401 = vmatpush3.msra.mxu1 %v166_v11  ;;  %v158_v27 = vld [vmem:[#allocation7 + $0x20] sm:$0xff]  ;;  %v246_v28 = vld [vmem:[#allocation7 + $0xa8] sm:$0xff]  ;;  %v157_v29 = vld [vmem:[#allocation7 + $0x18] sm:$0xff] }
  0x30   :  { %433 = vmatprep.subr.mxu0 %v571_v0  ;;  %402 = vmatprep.subr.mxu1 %v571_v0  ;;  %v245_v30 = vld [vmem:[#allocation7 + $0xa0] sm:$0xff]  ;;  %v156_v31 = vld [vmem:[#allocation7 + $0x10] sm:$0xff]  ;;  %v244_v32 = vld [vmem:[#allocation7 + $0x98] sm:$0xff] }
  0x31   :  { %434 = vmatpush3.msra.mxu0 %v254_v12  ;;  %403 = vmatpush3.msra.mxu1 %v165_v13  ;;  %v155_v33 = vld [vmem:[#allocation7 + $0x8] sm:$0xff]  ;;  %v243_v34 = vld [vmem:[#allocation7 + $0x90] sm:$0xff]  ;;  %v154_v35 = vld [vmem:[#allocation7] sm:$0xff] }
  0x32   :  { %435 = vmatprep.subr.mxu0 %v571_v0  ;;  %404 = vmatprep.subr.mxu1 %v571_v0  ;;  %v242_v36 = vld [vmem:[#allocation7 + $0x88] sm:$0xff]  ;;  %v241_v37 = vld [vmem:[#allocation7 + $0x80] sm:$0xff]  ;;  %v65_v41 = vld [vmem:[%s659_s2] sm:$0x3]  ;;  %s573_s2 = smov [#allocation8]  }
  0x33   :  { %436 = vmatpush3.msra.mxu0 %v253_v14  ;;  %405 = vmatpush3.msra.mxu1 %v164_v15  ;;  %v70_v43 = vrot.slane %v65_v41, %v69_v40  ;;  %v74_v44 = vrot.slane %v65_v41, %v73_v42  ;;  %v327_v51 = vld [vmem:[%s661_s4] sm:$0x3]  ;;  %s349_s13 = sshll.u32 %s573_s2, 4  ;;  %s350_s13 = int_to_ptr.vmem [resolvable:$true] %s349_s13 }
  0x34   :  { %437 = vmatprep.subr.mxu0 %v571_v0  ;;  %406 = vmatprep.subr.mxu1 %v571_v0  ;;  %v332_v52 = vrot.slane %v327_v51, %v69_v40  ;;  %v336_v53 = vrot.slane %v327_v51, %v73_v42  ;;  %s538_s14 = scalar_lea.vmem %s350_s13, 256  ;;  %p543_p2 = scmp.lt.s32.totalorder %s350_s13, %s350_s13 }
  0x35   :  { %438 = vmatpush3.msra.mxu0 %v252_v16  ;;  %407 = vmatpush3.msra.mxu1 %v163_v17  ;;  %p539_p1 = scmp.ne.s32.totalorder %s350_s13, %s538_s14  ;;  %p544_p3 = scmp.lt.s32.totalorder %s538_s14, %s538_s14 }
  0x36   :  { %439 = vmatprep.subr.mxu0 %v571_v0  ;;  %408 = vmatprep.subr.mxu1 %v571_v0 }
  0x37   :  { %440 = vmatpush3.msra.mxu0 %v251_v18  ;;  %409 = vmatpush3.msra.mxu1 %v162_v19  ;;  %p545_p4 = por %p544_p3, %p543_p2 }
  0x38   :  { %441 = vmatprep.subr.mxu0 %v571_v0  ;;  %410 = vmatprep.subr.mxu1 %v571_v0 }
  0x39   :  { %442 = vmatpush3.msra.mxu0 %v250_v20  ;;  %411 = vmatpush3.msra.mxu1 %v161_v21  ;;  %p546_p5 = pnand %p545_p4, %p539_p1 }
  0x3a   :  { %443 = vmatprep.subr.mxu0 %v571_v0  ;;  %412 = vmatprep.subr.mxu1 %v571_v0 }
  0x3b   :  { %444 = vmatpush3.msra.mxu0 %v249_v22  ;;  %413 = vmatpush3.msra.mxu1 %v160_v23 }
  0x3c   :  { %445 = vmatprep.subr.mxu0 %v571_v0  ;;  %414 = vmatprep.subr.mxu1 %v571_v0 }
  0x3d   :  { %446 = vmatpush3.msra.mxu0 %v248_v24  ;;  %415 = vmatpush3.msra.mxu1 %v159_v25 }
  0x3e   :  { %447 = vmatprep.subr.mxu0 %v571_v0  ;;  %416 = vmatprep.subr.mxu1 %v571_v0 }
  0x3f   :  { %448 = vmatpush3.msra.mxu0 %v247_v26  ;;  %417 = vmatpush3.msra.mxu1 %v158_v27 }
  0x40   :  { %449 = vmatprep.subr.mxu0 %v571_v0  ;;  %418 = vmatprep.subr.mxu1 %v571_v0 }
  0x41   :  { %450 = vmatpush3.msra.mxu0 %v246_v28  ;;  %419 = vmatpush3.msra.mxu1 %v157_v29 }
  0x42   :  { %451 = vmatprep.subr.mxu0 %v571_v0  ;;  %420 = vmatprep.subr.mxu1 %v571_v0 }
  0x43   :  { %452 = vmatpush3.msra.mxu0 %v245_v30  ;;  %421 = vmatpush3.msra.mxu1 %v156_v31 }
  0x44   :  { %453 = vmatprep.subr.mxu0 %v571_v0  ;;  %422 = vmatprep.subr.mxu1 %v571_v0 }
  0x45   :  { %454 = vmatpush3.msra.mxu0 %v244_v32  ;;  %423 = vmatpush3.msra.mxu1 %v155_v33 }
  0x46   :  { %455 = vmatprep.subr.mxu0 %v571_v0  ;;  %424 = vmatprep.subr.mxu1 %v571_v0 }
  0x47   :  { %456 = vmatpush3.msra.mxu0 %v243_v34  ;;  %425 = vmatpush3.msra.mxu1 %v154_v35 }
  0x48   :  { %457 = vmatprep.subr.mxu0 %v571_v0  ;;  %426 = vmatprep.mubr.msk.f32.mxu1 %vm572_vm1, %v571_v0 }
  0x49   :  { %458 = vmatpush3.msra.mxu0 %v242_v36  ;;  %461 = vmatprep.mubr.msk.f32.mxu0 %vm572_vm1, %v571_v0 }
  0x4a   :  { %459 = vmatprep.subr.mxu0 %v571_v0 }
  0x4b   :  { %460 = vmatpush3.msra.mxu0 %v241_v37 }
  0xec   :  { %v147_v45 = vpop.f32.mrf.mxu0 }
  0xed   :  { %v148_v46 = vadd.f32 %v147_v45, %v70_v43 }
  0xee   :  { %v149_v47 = vpop.f32.mrf.mxu0 }
  0xef   :  { %474 = vtanh.f32 %v148_v46  ;;  %v150_v48 = vadd.f32 %v149_v47, %v74_v44 }
  0xf1   :  { %476 = vtanh.f32 %v150_v48 }
  0xfc   :  { %v475_v49 = vpop.eup %474 }
  0xfd   :  { %427 = vmatmul.mubr.f32.vlgmr.msra.gmra.mxu1 %v475_v49 }
  0xfe   :  { %v477_v50 = vpop.eup %476 }
  0xff   :  { %462 = vmatmul.mubr.f32.vlgmr.msra.gmra.mxu0 %v477_v50 }
 0x1bd   :  { %v236_v54 = vpop.f32.mrf.mxu1 }
 0x1be   :  { %v339_v55 = vadd.f32 %v332_v52, %v236_v54 }
 0x1bf   :  { %v428_v56 = vpop.f32.mrf.mxu1  ;;  %v323_v57 = vpop.f32.mrf.mxu0 }
 0x1c0   :  { %341 = vst [vmem:[#allocation8] sm:$0xff] %v339_v55  ;;  %v340_v58 = vadd.f32 %v336_v53, %v323_v57 }
 0x1c1   :  { %v463_v59 = vpop.f32.mrf.mxu0 }
 0x1c2   :  { %342 = vst [vmem:[#allocation8 + $0x8] sm:$0xff] %v340_v58 }
 0x1c3   :  { %549 = shalt.err (!%p546_p5)
}
 0x1c4   :  { %352 = dma.vmem_to_hbm [thread:$0]  %s350_s13, 256, %s662_s5, [#allocation4]  }
 0x1c5   :  { %562 = dma.done.wait [#allocation4], 256  }
 0x1c6   :  { %563 = vsyncadd [#allocation4], 4294967040 }
 0x1c7   :  { %356 = vsyncpa [#allocation3], 1 }
 0x1c8   :  { %357 = vsyncpa [#allocation6], 1 }
 0x1c9   :  { %358 = vsyncpa [#allocation4], 1 }

</bundles_post_ra>
